<compile_context>
chip_gen: v7x
topology: tpu7x:2x2x1
jax: 0.10.0
libtpu: 0.0.40
codegen_flags: <defaults>
</compile_context>

<pallas_src>
import jax
import jax.numpy as jnp
from jax.experimental import pallas as pl
from jax.experimental.pallas import tpu as pltpu

C_PAD = 128                      # lane-dense padded class dimension
VMEM_LIMIT_BYTES = 48 * 1024 * 1024   # leave headroom even on v7x (64 MiB physical)
FUSED_PAYLOAD_LIMIT = 40 * 1024 * 1024


# --------------------------------------------------------------------------- #
# Kernels
# --------------------------------------------------------------------------- #
def gcn_fused_kernel(adj_ref, xw1_ref, x_ref, b1_ref, w23_ref, wd3_ref, bf_ref,
                     out_ref):
    """Whole forward in one kernel (adjacency and h1 stay VMEM-resident).

    h1     = relu(Ahat @ XW1 + b1)
    logits = (Ahat @ h1) @ (W2 W3) + X @ (Wd W3) + b_fused
    out    = log_softmax(logits)      (pad lanes carry -1e30 bias)
    """
    h1 = jnp.maximum(
        jnp.dot(adj_ref[...], xw1_ref[...], preferred_element_type=jnp.float32)
        + b1_ref[...], 0.0)
    # TODO(synk): training-mode dropout (p=0.5) not implemented; eval semantics only.
    ah = jnp.dot(adj_ref[...], h1.astype(jnp.bfloat16),
                 preferred_element_type=jnp.float32)
    logits = (jnp.dot(ah.astype(jnp.bfloat16), w23_ref[...],
                      preferred_element_type=jnp.float32)
              + jnp.dot(x_ref[...], wd3_ref[...],
                        preferred_element_type=jnp.float32)
              + bf_ref[...])
    m = jnp.max(logits, axis=-1, keepdims=True)
    z = logits - m
    out_ref[...] = z - jnp.log(jnp.sum(jnp.exp(z), axis=-1, keepdims=True))


def gcn_layer1_kernel(adj_ref, xw1_ref, b1_ref, h1_ref, acc_ref):
    """h1 row-block = relu(Ahat @ XW1 + b1), reduced over the k grid axis.

    XW1 is pre-projected in the wrapper, so there is no epilogue matmul and the
    f32 accumulator is never cast to bf16 before further contraction.
    """
    k = pl.program_id(1)

    @pl.when(k == 0)
    def _():
        acc_ref[...] = jnp.zeros_like(acc_ref)

    acc_ref[...] += jnp.dot(adj_ref[...], xw1_ref[...],
                            preferred_element_type=jnp.float32)

    @pl.when(k == pl.num_programs(1) - 1)
    def _():
        # TODO(synk): training-mode dropout (p=0.5) not implemented; eval semantics only.
        h1_ref[...] = jnp.maximum(acc_ref[...] + b1_ref[...], 0.0).astype(h1_ref.dtype)


def gcn_layer2_kernel(adj_ref, h1_ref, x_ref, w23_ref, wd3_ref, bf_ref,
                      out_ref, acc_ref):
    """out row-block = log_softmax((Ahat@h1)@(W2W3) + X@(WdW3) + b_fused)."""
    k = pl.program_id(1)

    @pl.when(k == 0)
    def _():
        acc_ref[...] = jnp.zeros_like(acc_ref)

    acc_ref[...] += jnp.dot(adj_ref[...], h1_ref[...],
                            preferred_element_type=jnp.float32)

    @pl.when(k == pl.num_programs(1) - 1)
    def _():
        logits = (jnp.dot(acc_ref[...].astype(jnp.bfloat16), w23_ref[...],
                          preferred_element_type=jnp.float32)
                  + jnp.dot(x_ref[...], wd3_ref[...],
                            preferred_element_type=jnp.float32)
                  + bf_ref[...])                      # pad lanes carry -1e30 (f32 only!)
        m = jnp.max(logits, axis=-1, keepdims=True)
        z = logits - m
        out_ref[...] = z - jnp.log(jnp.sum(jnp.exp(z), axis=-1, keepdims=True))


# --------------------------------------------------------------------------- #
# Wrapper
# --------------------------------------------------------------------------- #
def _pick_tile(n, target, *, lane_axis):
    """Largest tile <= target that divides n and satisfies TPU alignment
    (lane axis: multiple of 128; sublane axis: multiple of 8); fallback n."""
    align = 128 if lane_axis else 8
    t = (min(target, n) // align) * align
    while t >= align:
        if n % t == 0:
            return t
        t -= align
    return n


def gnn_origin_gcn_forward(x, adj_norm, params, *, tm=None, tk=None,
                           force_streamed=False, adj_buffer_count=2):
    """x: [N, F] f32, adj_norm: [N, N] f32, params: dict -> log-probs [N, C]."""
    N, F = x.shape
    H = params["w1"].shape[1]
    C = params["w3"].shape[1]
    H_PAD = ((H + 127) // 128) * 128            # lane-dense hidden dim

    # bf16 MXU operands (accumulation stays f32 in-kernel).
    adj_bf = adj_norm.astype(jnp.bfloat16)
    x_bf = x.astype(jnp.bfloat16)

    # Pre-project X@W1 (review item: removes epilogue matmul + accumulator cast).
    xw1 = x @ params["w1"]                                              # [N, H] f32
    xw1p = (jnp.zeros((N, H_PAD), jnp.float32).at[:, :H].set(xw1)
            .astype(jnp.bfloat16))
    b1p = jnp.zeros((1, H_PAD), jnp.float32).at[:, :H].set(params["b1"])

    # Fold conv2-weight / down_sample / linear1 into two lane-dense RHS matrices:
    #   logits = (Ahat@h1) @ (W2@W3) + X @ (Wd@W3) + ((b2+bd)@W3 + b3)
    # Pad class dim C -> 128; pad biases are -1e30 so log_softmax masks them
    # (valid ONLY because logits / output stay f32 — do not narrow to bf16).
    w23 = params["w2"] @ params["w3"]                                   # [H, C]
    wd3 = params["wd"] @ params["w3"]                                   # [F, C]
    bfused = (params["b2"] + params["bd"]) @ params["w3"] + params["b3"]
    w23p = (jnp.zeros((H_PAD, C_PAD), jnp.float32).at[:H, :C].set(w23)
            .astype(jnp.bfloat16))
    wd3p = (jnp.zeros((F, C_PAD), jnp.float32).at[:, :C].set(wd3)
            .astype(jnp.bfloat16))
    bfp = jnp.full((1, C_PAD), -1e30, jnp.float32).at[:, :C].set(bfused)

    # ---------------- fused single-call path (small / medium N) -------------
    # Rough VMEM payload (x2 for Pallas input buffering).
    fused_bytes = (2 * (N * N * 2 + N * H_PAD * 2 + N * F * 2
                        + H_PAD * C_PAD * 2 + F * C_PAD * 2)
                   + N * C_PAD * 4)
    if not force_streamed and fused_bytes <= FUSED_PAYLOAD_LIMIT:
        out_pad = pl.pallas_call(
            gcn_fused_kernel,
            out_shape=jax.ShapeDtypeStruct((N, C_PAD), jnp.float32),
            compiler_params=pltpu.CompilerParams(
                vmem_limit_bytes=VMEM_LIMIT_BYTES),
            cost_estimate=pl.CostEstimate(
                flops=int(4 * N * N * H_PAD + 2 * N * H_PAD * C_PAD
                          + 2 * N * F * C_PAD),
                transcendentals=int(N * C_PAD),
                bytes_accessed=int(2 * N * N + 2 * N * H_PAD + 2 * N * F
                                   + 2 * H_PAD * C_PAD + 2 * F * C_PAD
                                   + 4 * N * C_PAD)),
        )(adj_bf, xw1p, x_bf, b1p, w23p, wd3p, bfp)
        return out_pad[:, :C]

    # ---------------- streamed two-call path (large N) ----------------------
    if tm is None:
        # keep >= 2 i-blocks so the parallel axis can use both v7x TensorCores
        tm = _pick_tile(N, min(1024, max(8, N // 2)), lane_axis=False)
    if tk is None:
        tk = _pick_tile(N, 2048, lane_axis=True)
    assert N % tm == 0 and N % tk == 0, "pick tm/tk that divide N"
    assert (tk % 128 == 0) or (tk == N), "tk must be lane-aligned (x128) or == N"
    grid = (N // tm, N // tk)

    adj_spec = pl.BlockSpec((tm, tk), lambda i, k: (i, k))
    if adj_buffer_count != 2:
        # e.g. Buffered(3) on v7x if the adjacency DMA is still exposed.
        adj_spec = pl.BlockSpec((tm, tk), lambda i, k: (i, k),
                                pipeline_mode=pl.Buffered(adj_buffer_count))

    cparams = pltpu.CompilerParams(
        dimension_semantics=("parallel", "arbitrary"),
        vmem_limit_bytes=VMEM_LIMIT_BYTES,
    )
    full = lambda shape: pl.BlockSpec(shape, lambda i, k: (0, 0))
    n_iblk = N // tm

    # --- layer 1: h1 = relu((Ahat @ XW1) + b1) ------------------------------
    h1 = pl.pallas_call(
        gcn_layer1_kernel,
        out_shape=jax.ShapeDtypeStruct((N, H_PAD), jnp.bfloat16),
        grid=grid,
        in_specs=[
            adj_spec,                                       # Ahat tile
            pl.BlockSpec((tk, H_PAD), lambda i, k: (k, 0)),  # XW1 rows (reduction)
            full((1, H_PAD)),                               # b1 (resident)
        ],
        out_specs=pl.BlockSpec((tm, H_PAD), lambda i, k: (i, 0)),
        scratch_shapes=[pltpu.VMEM((tm, H_PAD), jnp.float32)],
        compiler_params=cparams,
        cost_estimate=pl.CostEstimate(
            flops=int(2 * N * N * H_PAD),
            transcendentals=0,
            bytes_accessed=int(2 * N * N               # adjacency (bf16, once)
                               + 2 * n_iblk * N * H_PAD  # XW1 re-read per i-block
                               + 2 * N * H_PAD          # h1 writeback
                               + 4 * H_PAD)),           # b1
    )(adj_bf, xw1p, b1p)

    # --- layer 2 + residual + linear1 + log_softmax -------------------------
    out_pad = pl.pallas_call(
        gcn_layer2_kernel,
        out_shape=jax.ShapeDtypeStruct((N, C_PAD), jnp.float32),
        grid=grid,
        in_specs=[
            adj_spec,                                       # Ahat tile
            pl.BlockSpec((tk, H_PAD), lambda i, k: (k, 0)),  # h1 rows (reduction)
            pl.BlockSpec((tm, F), lambda i, k: (i, 0)),     # X rows (residual path)
            full((H_PAD, C_PAD)),                           # W2@W3 (padded, resident)
            full((F, C_PAD)),                               # Wd@W3 (padded, resident)
            full((1, C_PAD)),                               # fused bias (-1e30 pads)
        ],
        out_specs=pl.BlockSpec((tm, C_PAD), lambda i, k: (i, 0)),
        scratch_shapes=[pltpu.VMEM((tm, H_PAD), jnp.float32)],
        compiler_params=cparams,
        cost_estimate=pl.CostEstimate(
            flops=int(2 * N * N * H_PAD + 2 * N * H_PAD * C_PAD
                      + 2 * N * F * C_PAD),
            transcendentals=int(N * C_PAD),
            bytes_accessed=int(2 * N * N               # adjacency (bf16, once)
                               + 2 * n_iblk * N * H_PAD  # h1 re-read per i-block
                               + 2 * N * F              # X residual rows
                               + 2 * H_PAD * C_PAD + 2 * F * C_PAD + 4 * C_PAD
                               + 4 * N * C_PAD)),       # f32 padded output
    )(adj_bf, h1, x_bf, w23p, wd3p, bfp)

    return out_pad[:, :C]


# --------------------------------------------------------------------------- #
# Plain-JAX glue + reference
# --------------------------------------------------------------------------- #
def build_gcn_norm_adj(edge_index, num_nodes):
    """Dense Ahat = D^{-1/2}(A + I)D^{-1/2}; edge (src -> dst) aggregates into dst."""
    src, dst = edge_index[0], edge_index[1]
    a = jnp.zeros((num_nodes, num_nodes), jnp.float32).at[dst, src].add(1.0)
    # add_remaining_self_loops semantics: ensure every node has a self-loop of
    # weight >= 1 without double-counting pre-existing self edges.
    eye = jnp.eye(num_nodes, dtype=bool)
    a = jnp.where(eye, jnp.maximum(a, 1.0), a)
    deg = jnp.sum(a, axis=1)
    d_inv_sqrt = 1.0 / jnp.sqrt(deg)                   # deg >= 1 thanks to self loops
    return a * d_inv_sqrt[:, None] * d_inv_sqrt[None, :]


def gnn_origin_gcn_reference(x, adj_norm, params):
    """Pure-JAX f32 reference of the original module forward (eval mode)."""
    orig = x @ params["wd"] + params["bd"]
    h1 = jnp.maximum(adj_norm @ (x @ params["w1"]) + params["b1"], 0.0)
    h2 = adj_norm @ (h1 @ params["w2"]) + params["b2"]
    logits = (h2 + orig) @ params["w3"] + params["b3"]
    return jax.nn.log_softmax(logits, axis=-1)


def init_params(key, num_features, hid_size, num_classes):
    ks = jax.random.split(key, 8)
    scale = 0.1
    return {
        # GCNConv1: F -> H
        "w1": scale * jax.random.normal(ks[0], (num_features, hid_size), jnp.float32),
        "b1": jnp.zeros((1, hid_size), jnp.float32),
        # GCNConv2: H -> H
        "w2": scale * jax.random.normal(ks[1], (hid_size, hid_size), jnp.float32),
        "b2": jnp.zeros((1, hid_size), jnp.float32),
        # down_sample: F -> H
        "wd": scale * jax.random.normal(ks[2], (num_features, hid_size), jnp.float32),
        "bd": scale * jax.random.normal(ks[3], (1, hid_size), jnp.float32),
        # linear1: H -> C
        "w3": scale * jax.random.normal(ks[4], (hid_size, num_classes), jnp.float32),
        "b3": scale * jax.random.normal(ks[5], (1, num_classes), jnp.float32),
    }


def _make_graph(key, num_nodes, num_features, num_edges):
    k_x, k_e = jax.random.split(key, 2)
    x = jax.random.normal(k_x, (num_nodes, num_features), jnp.float32)
    src = jax.random.randint(k_e, (num_edges,), 0, num_nodes)
    dst = jax.random.randint(jax.random.fold_in(k_e, 1), (num_edges,), 0, num_nodes)
    edge_index = jnp.stack([jnp.concatenate([src, dst]),
                            jnp.concatenate([dst, src])], axis=0)
    adj_norm = build_gcn_norm_adj(edge_index, num_nodes)
    return x, adj_norm


def _check(out, ref, num_classes, tag):
    assert out.shape == ref.shape, f"{tag}: bad shape {out.shape}"
    row_sums = jnp.sum(jnp.exp(out), axis=-1)
    assert bool(jnp.all(jnp.abs(row_sums - 1.0) < 1e-4)), f"{tag}: rows not normalized"
    max_err = float(jnp.max(jnp.abs(out - ref)))
    assert max_err < 0.25, f"{tag}: max abs err vs f32 reference too large: {max_err}"


if __name__ == "__main__":
    key = jax.random.PRNGKey(0)
    k_g1, k_g2, k_p = jax.random.split(key, 3)

    num_features = 16
    hid_size = 32
    num_classes = 8
    params = init_params(k_p, num_features, hid_size, num_classes)

    # ---- fused single-call path (small graph, N = 128) ----------------------
    x1, adj1 = _make_graph(k_g1, 128, num_features, 256)
    out1 = jax.block_until_ready(gnn_origin_gcn_forward(x1, adj1, params))
    ref1 = gnn_origin_gcn_reference(x1, adj1, params)
    _check(out1, ref1, num_classes, "fused")

    # ---- streamed two-call path with a real (i, k) grid (N = 256) -----------
    x2, adj2 = _make_graph(k_g2, 256, num_features, 512)
    out2 = jax.block_until_ready(
        gnn_origin_gcn_forward(x2, adj2, params, tm=128, tk=128,
                               force_streamed=True))
    ref2 = gnn_origin_gcn_reference(x2, adj2, params)
    _check(out2, ref2, num_classes, "streamed")

    print("KERNEL_OK")
</pallas_src>

<mosaic_0001>
module attributes {stable_mosaic.version = 11 : i64} {
  func.func @gcn_fused_kernel(%arg0: memref<128x128xbf16, #tpu.memory_space<vmem>>, %arg1: memref<128x128xbf16, #tpu.memory_space<vmem>>, %arg2: memref<128x16xbf16, #tpu.memory_space<vmem>>, %arg3: memref<1x128xf32, #tpu.memory_space<vmem>>, %arg4: memref<128x128xbf16, #tpu.memory_space<vmem>>, %arg5: memref<16x128xbf16, #tpu.memory_space<vmem>>, %arg6: memref<1x128xf32, #tpu.memory_space<vmem>>, %arg7: memref<128x128xf32, #tpu.memory_space<vmem>>) attributes {dimension_semantics = [], scalar_prefetch = 0 : i64, scratch_operands = 0 : i64, tpu.core_type = #tpu.core_type<tc>} {
    %c0 = arith.constant 0 : index
    %c0_0 = arith.constant 0 : index
    %0 = vector.load %arg0[%c0, %c0_0] : memref<128x128xbf16, #tpu.memory_space<vmem>>, vector<128x128xbf16>
    %c0_1 = arith.constant 0 : index
    %c0_2 = arith.constant 0 : index
    %1 = vector.load %arg1[%c0_1, %c0_2] : memref<128x128xbf16, #tpu.memory_space<vmem>>, vector<128x128xbf16>
    %cst = arith.constant dense<0.000000e+00> : vector<128x128xf32>
    %2 = tpu.matmul %0, %1, %cst {dimension_numbers = #tpu.dot_dimension_numbers<[1], [0], [0], [1], [0, 0, 1, 1], [], []>} : vector<128x128xbf16>, vector<128x128xbf16>, vector<128x128xf32> -> vector<128x128xf32>
    %c0_3 = arith.constant 0 : index
    %c0_4 = arith.constant 0 : index
    %3 = vector.load %arg3[%c0_3, %c0_4] : memref<1x128xf32, #tpu.memory_space<vmem>>, vector<1x128xf32>
    %4 = vector.broadcast %3 : vector<1x128xf32> to vector<128x128xf32>
    %5 = arith.addf %2, %4 : vector<128x128xf32>
    %cst_5 = arith.constant 0.000000e+00 : f32
    %6 = vector.broadcast %cst_5 : f32 to vector<128x128xf32>
    %7 = arith.maximumf %5, %6 : vector<128x128xf32>
    %c0_6 = arith.constant 0 : index
    %c0_7 = arith.constant 0 : index
    %8 = vector.load %arg0[%c0_6, %c0_7] : memref<128x128xbf16, #tpu.memory_space<vmem>>, vector<128x128xbf16>
    %9 = arith.truncf %7 : vector<128x128xf32> to vector<128x128xbf16>
    %cst_8 = arith.constant dense<0.000000e+00> : vector<128x128xf32>
    %10 = tpu.matmul %8, %9, %cst_8 {dimension_numbers = #tpu.dot_dimension_numbers<[1], [0], [0], [1], [0, 0, 1, 1], [], []>} : vector<128x128xbf16>, vector<128x128xbf16>, vector<128x128xf32> -> vector<128x128xf32>
    %11 = arith.truncf %10 : vector<128x128xf32> to vector<128x128xbf16>
    %c0_9 = arith.constant 0 : index
    %c0_10 = arith.constant 0 : index
    %12 = vector.load %arg4[%c0_9, %c0_10] : memref<128x128xbf16, #tpu.memory_space<vmem>>, vector<128x128xbf16>
    %cst_11 = arith.constant dense<0.000000e+00> : vector<128x128xf32>
    %13 = tpu.matmul %11, %12, %cst_11 {dimension_numbers = #tpu.dot_dimension_numbers<[1], [0], [0], [1], [0, 0, 1, 1], [], []>} : vector<128x128xbf16>, vector<128x128xbf16>, vector<128x128xf32> -> vector<128x128xf32>
    %c0_12 = arith.constant 0 : index
    %c0_13 = arith.constant 0 : index
    %14 = vector.load %arg2[%c0_12, %c0_13] : memref<128x16xbf16, #tpu.memory_space<vmem>>, vector<128x16xbf16>
    %c0_14 = arith.constant 0 : index
    %c0_15 = arith.constant 0 : index
    %15 = vector.load %arg5[%c0_14, %c0_15] : memref<16x128xbf16, #tpu.memory_space<vmem>>, vector<16x128xbf16>
    %cst_16 = arith.constant dense<0.000000e+00> : vector<128x128xf32>
    %16 = tpu.matmul %14, %15, %cst_16 {dimension_numbers = #tpu.dot_dimension_numbers<[1], [0], [0], [1], [0, 0, 1, 1], [], []>} : vector<128x16xbf16>, vector<16x128xbf16>, vector<128x128xf32> -> vector<128x128xf32>
    %17 = arith.addf %13, %16 : vector<128x128xf32>
    %c0_17 = arith.constant 0 : index
    %c0_18 = arith.constant 0 : index
    %18 = vector.load %arg6[%c0_17, %c0_18] : memref<1x128xf32, #tpu.memory_space<vmem>>, vector<1x128xf32>
    %19 = vector.broadcast %18 : vector<1x128xf32> to vector<128x128xf32>
    %20 = arith.addf %17, %19 : vector<128x128xf32>
    %cst_19 = arith.constant dense<0xFF800000> : vector<128xf32>
    %21 = vector.multi_reduction <maximumf>, %20, %cst_19 [1] : vector<128x128xf32> to vector<128xf32>
    %22 = vector.shape_cast %21 : vector<128xf32> to vector<128x1xf32>
    %23 = vector.broadcast %22 : vector<128x1xf32> to vector<128x128xf32>
    %24 = arith.subf %20, %23 : vector<128x128xf32>
    %25 = math.exp %24 : vector<128x128xf32>
    %cst_20 = arith.constant dense<0.000000e+00> : vector<128xf32>
    %26 = vector.multi_reduction <add>, %25, %cst_20 [1] : vector<128x128xf32> to vector<128xf32>
    %27 = vector.shape_cast %26 : vector<128xf32> to vector<128x1xf32>
    %28 = math.log %27 : vector<128x1xf32>
    %29 = vector.broadcast %28 : vector<128x1xf32> to vector<128x128xf32>
    %30 = arith.subf %24, %29 : vector<128x128xf32>
    %c0_21 = arith.constant 0 : index
    %c0_22 = arith.constant 0 : index
    %31 = vector.load %arg7[%c0_21, %c0_22] : memref<128x128xf32, #tpu.memory_space<vmem>>, vector<128x128xf32>
    tpu.vector_store %arg7[%c0_21, %c0_22], %30 {strides = array<i32>} : memref<128x128xf32, #tpu.memory_space<vmem>>, vector<128x128xf32>,
    return
  }
}

</mosaic_0001>

<bundles_post_ra>
// kernel: tpu_custom_call.1
= control target key start
LH: loop header
LB: loop body
LE: loop exit
PB: predicated region body
PF: predicated region fallthrough
CT: control target
= control target key end

     0   :  { %12 = vsyncpa [#allocation3], 0  ;;  %s1647_s0 = inlined_call_operand.vmem [shape: bf16[128,128], index: 0, kind: input, shape index: {}]   ;;  %s1648_s1 = inlined_call_operand.hbm [shape: bf16[128,128], index: 1, kind: input, shape index: {}]   ;;  %s1649_s2 = inlined_call_operand.vmem [shape: bf16[128,16], index: 2, kind: input, shape index: {}]   ;;  %s1650_s3 = inlined_call_operand.vmem [shape: f32[1,128], index: 3, kind: input, shape index: {}]   ;;  %s1651_s4 = inlined_call_operand.hbm [shape: bf16[128,128], index: 4, kind: input, shape index: {}]   ;;  %s1652_s5 = inlined_call_operand.vmem [shape: bf16[16,128], index: 5, kind: input, shape index: {}]   ;;  %s1653_s6 = inlined_call_operand.vmem [shape: f32[1,128], index: 6, kind: input, shape index: {}]   ;;  %s1654_s7 = inlined_call_operand.hbm [shape: f32[128,128], index: 7, kind: output, shape index: {}]  }
   0x1   :  { %13 = vsyncpa [#allocation6], 0 }
   0x2   :  { %14 = vsyncpa [#allocation4], 0  ;;  %s1387_s24 = smov [#allocation2]   ;;  %s1315_s28 = scalar_lea.hbm %s1648_s1, 1024 }
   0x3   :  { %s22_s25 = sshll.u32 %s1387_s24, 4  ;;  %p1316_p0 = scmp.ne.s32.totalorder %s1648_s1, %s1315_s28  ;;  %s23_s25 = int_to_ptr.vmem [resolvable:$true] %s22_s25 }
   0x4   :  { %p1319_p1 = scmp.lt.u32.totalorder %s1315_s28, %s1648_s1 }
   0x6   :  { %p1321_p2 = pnand %p1319_p1, %p1316_p0 }
   0x8   :  { %1324 = shalt.err (!%p1321_p2)
}
   0x9   :  { %s1325_s10 = scalar_lea.vmem %s23_s25, 1024  ;;  %p1330_p4 = scmp.lt.s32.totalorder %s23_s25, %s23_s25 }
   0xa   :  { %p1326_p3 = scmp.ne.s32.totalorder %s23_s25, %s1325_s10  ;;  %p1331_p5 = scmp.lt.s32.totalorder %s1325_s10, %s1325_s10 }
   0xc   :  { %p1332_p6 = por %p1331_p5, %p1330_p4 }
   0xe   :  { %p1333_p7 = pnand %p1332_p6, %p1326_p3 }
  0x10   :  { %1336 = shalt.err (!%p1333_p7)
}
  0x11   :  { %s1388_s11 = smov 64   ;;  %s1389_s12 = smov 4  }
  0x12   :  { %28 = dma.hbm_to_vmem [thread:$0]  %s1648_s1, 1024, %s23_s25, [#allocation3], %s1388_s11, %s1388_s11, %s1389_s12  }
  0x13   :  { %s1390_s15 = smov [#allocation5]   ;;  %s1337_s19 = scalar_lea.hbm %s1651_s4, 1024 }
  0x14   :  { %s38_s16 = sshll.u32 %s1390_s15, 4  ;;  %p1338_p8 = scmp.ne.s32.totalorder %s1651_s4, %s1337_s19  ;;  %s39_s16 = int_to_ptr.vmem [resolvable:$true] %s38_s16 }
  0x15   :  { %p1341_p9 = scmp.lt.u32.totalorder %s1337_s19, %s1651_s4 }
  0x17   :  { %p1343_p10 = pnand %p1341_p9, %p1338_p8 }
  0x19   :  { %1346 = shalt.err (!%p1343_p10)
}
  0x1a   :  { %s1347_s24 = scalar_lea.vmem %s39_s16, 1024  ;;  %p1352_p12 = scmp.lt.s32.totalorder %s39_s16, %s39_s16 }
  0x1b   :  { %p1348_p11 = scmp.ne.s32.totalorder %s39_s16, %s1347_s24  ;;  %p1353_p13 = scmp.lt.s32.totalorder %s1347_s24, %s1347_s24 }
  0x1d   :  { %p1354_p0 = por %p1353_p13, %p1352_p12 }
  0x1f   :  { %p1355_p1 = pnand %p1354_p0, %p1348_p11 }
  0x21   :  { %1358 = shalt.err (!%p1355_p1)
}
  0x22   :  { %44 = dma.hbm_to_vmem [thread:$0]  %s1651_s4, 1024, %s39_s16, [#allocation6], %s1388_s11, %s1388_s11, %s1389_s12  }
  0x23   :  { %1381 = dma.done.wait [#allocation3], 1024  }
  0x24   :  { %1382 = vsyncadd [#allocation3], 4294966272 }
  0x25   :  { %1383 = dma.done.wait [#allocation6], 1024  }
  0x26   :  { %1384 = vsyncadd [#allocation6], 4294966272  ;;  %v1218_v0 = vld [vmem:[#allocation2] sm:$0xff]   ;;  %v1219_v1 = vld [vmem:[#allocation2 + $0x8] sm:$0xff]   ;;  %vm497_vm0 = vcmask 130048  }
  0x27   :  { %1081 = vmatprep.subr.bf16.mxu1 %v1218_v0  ;;  %v1220_v2 = vld [vmem:[#allocation2 + $0x10] sm:$0xff]   ;;  %v1221_v3 = vld [vmem:[#allocation2 + $0x18] sm:$0xff]   ;;  %v1226_v4 = vld [vmem:[%s1647_s0] sm:$0xff]  }
  0x28   :  { %1082 = vmatpush3.bf16.msra.mxu1 %v1218_v0  ;;  %1097 = vmatprep.mubr.bf16.mxu1 %v1226_v4  ;;  %v1222_v5 = vld [vmem:[#allocation2 + $0x20] sm:$0xff]   ;;  %v1223_v6 = vld [vmem:[#allocation2 + $0x28] sm:$0xff]   ;;  %v1224_v7 = vld [vmem:[#allocation2 + $0x30] sm:$0xff]  }
  0x29   :  { %1083 = vmatprep.subr.bf16.mxu1 %v1219_v1  ;;  %v1225_v8 = vld [vmem:[#allocation2 + $0x38] sm:$0xff]   ;;  %v1464_v9 = vld [vmem:[%s1647_s0 + $0x8] sm:$0xff]   ;;  %v1469_v10 = vld [vmem:[%s1647_s0 + $0x10] sm:$0xff]  }
  0x2a   :  { %v1476_v11 = vld [vmem:[%s1647_s0 + $0x18] sm:$0xff]   ;;  %v1481_v12 = vld [vmem:[%s1647_s0 + $0x20] sm:$0xff]   ;;  %v1488_v13 = vld [vmem:[%s1647_s0 + $0x28] sm:$0xff]  }
  0x2b   :  { %v1493_v14 = vld [vmem:[%s1647_s0 + $0x30] sm:$0xff]   ;;  %v1500_v15 = vld [vmem:[%s1647_s0 + $0x38] sm:$0xff]   ;;  %v1234_v16 = vld [vmem:[%s1652_s5] sm:$0xff]  }
  0x2c   :  { %1084 = vmatpush3.bf16.msra.mxu1 %v1219_v1  ;;  %v1235_v17 = vld [vmem:[%s1649_s2] sm:$0xff]   ;;  %1145 = vmatprep.subr.bf16.mxu0 %v1234_v16  ;;  %v1236_v19 = vld [vmem:[%s1649_s2 + $0x8] sm:$0xff]   ;;  %v1239_v20 = vld [vmem:[%s1649_s2 + $0x10] sm:$0xff]  }
  0x2d   :  { %1085 = vmatprep.subr.bf16.mxu1 %v1220_v2  ;;  %v1237_v18 = vld [vmem:[#allocation5] sm:$0xff]   ;;  %1147 = vmatprep.mubr.msk.bf16.mxu0 %vm497_vm0, %v1235_v17  ;;  %v1238_v21 = vld [vmem:[#allocation5 + $0x8] sm:$0xff]   ;;  %v1241_v22 = vld [vmem:[#allocation5 + $0x10] sm:$0xff]  }
  0x2e   :  { %1146 = vmatpush3.bf16.msra.mxu0 %v1234_v16  ;;  %v1240_v23 = vld [vmem:[%s1649_s2 + $0x18] sm:$0xff]   ;;  %v1243_v24 = vld [vmem:[%s1649_s2 + $0x20] sm:$0xff]   ;;  %v1244_v27 = vld [vmem:[%s1649_s2 + $0x28] sm:$0xff]  }
  0x2f   :  { %1163 = vmatprep.subr.bf16.mxu0 %v1237_v18  ;;  %v1242_v25 = vld [vmem:[#allocation5 + $0x18] sm:$0xff]   ;;  %v1245_v26 = vld [vmem:[#allocation5 + $0x20] sm:$0xff]   ;;  %v1247_v28 = vld [vmem:[%s1649_s2 + $0x30] sm:$0xff]  }
  0x30   :  { %1086 = vmatpush3.bf16.msra.mxu1 %v1220_v2  ;;  %v1246_v29 = vld [vmem:[#allocation5 + $0x28] sm:$0xff]   ;;  %v1249_v30 = vld [vmem:[#allocation5 + $0x30] sm:$0xff]   ;;  %v1248_v31 = vld [vmem:[%s1649_s2 + $0x38] sm:$0xff]  }
  0x31   :  { %1087 = vmatprep.subr.bf16.mxu1 %v1221_v3  ;;  %1148 = vmatmul.mubr.msk.bf16.vlgmr.msra.gmra.mrb[0].mxu0 %vm497_vm0, %v1236_v19  ;;  %v981_v32 = vld [vmem:[%s1650_s3] ss:$0 sm:$0xff] }
  0x32   :  { %1164 = vmatpush3.bf16.msra.mxu0 %v1237_v18  ;;  %1151 = vmatprep.mubr.msk.bf16.mxu0 %vm497_vm0, %v1239_v20 }
  0x33   :  { %1165 = vmatprep.subr.bf16.mxu0 %v1238_v21 }
  0x34   :  { %1088 = vmatpush3.bf16.msra.mxu1 %v1221_v3 }
  0x35   :  { %1089 = vmatprep.subr.bf16.mxu1 %v1222_v5 }
  0x36   :  { %1166 = vmatpush3.bf16.msra.mxu0 %v1238_v21 }
  0x37   :  { %1167 = vmatprep.subr.bf16.mxu0 %v1241_v22 }
  0x38   :  { %1090 = vmatpush3.bf16.msra.mxu1 %v1222_v5 }
  0x39   :  { %1091 = vmatprep.subr.bf16.mxu1 %v1223_v6  ;;  %1152 = vmatmul.mubr.msk.bf16.gmra.mrb[4].mxu0 %vm497_vm0, %v1240_v23 }
  0x3a   :  { %1168 = vmatpush3.bf16.msra.mxu0 %v1241_v22  ;;  %1155 = vmatprep.mubr.msk.bf16.mxu0 %vm497_vm0, %v1243_v24 }
  0x3b   :  { %1169 = vmatprep.subr.bf16.mxu0 %v1242_v25 }
  0x3c   :  { %1092 = vmatpush3.bf16.msra.mxu1 %v1223_v6 }
  0x3d   :  { %1093 = vmatprep.subr.bf16.mxu1 %v1224_v7 }
  0x3e   :  { %1170 = vmatpush3.bf16.msra.mxu0 %v1242_v25 }
  0x3f   :  { %1171 = vmatprep.subr.bf16.mxu0 %v1245_v26 }
  0x40   :  { %1094 = vmatpush3.bf16.msra.mxu1 %v1224_v7 }
  0x41   :  { %1095 = vmatprep.subr.bf16.mxu1 %v1225_v8  ;;  %1156 = vmatmul.mubr.msk.bf16.gmra.mrb[8].mxu0 %vm497_vm0, %v1244_v27 }
  0x42   :  { %1172 = vmatpush3.bf16.msra.mxu0 %v1245_v26  ;;  %1159 = vmatprep.mubr.msk.bf16.mxu0 %vm497_vm0, %v1247_v28 }
  0x43   :  { %1173 = vmatprep.subr.bf16.mxu0 %v1246_v29 }
  0x44   :  { %1096 = vmatpush3.bf16.msra.mxu1 %v1225_v8 }
  0x46   :  { %1174 = vmatpush3.bf16.msra.mxu0 %v1246_v29 }
  0x47   :  { %1098 = vmatmul.mubr.bf16.vlgmr.msra.gmra.mrb[0].mxu1 %v1464_v9  ;;  %1175 = vmatprep.subr.bf16.mxu0 %v1249_v30 }
  0x48   :  { %1101 = vmatprep.mubr.bf16.mxu1 %v1469_v10 }
  0x49   :  { %1160 = vmatmul.mubr.msk.bf16.gmra.mrb[12].mxu0 %vm497_vm0, %v1248_v31 }
  0x4a   :  { %1176 = vmatpush3.bf16.msra.mxu0 %v1249_v30 }
  0x4f   :  { %1102 = vmatmul.mubr.bf16.gmra.mrb[4].mxu1 %v1476_v11 }
  0x50   :  { %1105 = vmatprep.mubr.bf16.mxu1 %v1481_v12 }
  0x57   :  { %1106 = vmatmul.mubr.bf16.gmra.mrb[8].mxu1 %v1488_v13 }
  0x58   :  { %1109 = vmatprep.mubr.bf16.mxu1 %v1493_v14 }
  0x5f   :  { %1110 = vmatmul.mubr.bf16.gmra.mrb[12].mxu1 %v1500_v15 }
  0x60   :  { %1129 = vmatprep.mubr.bf16.mxu1 %v1226_v4 }
 0x11a   :  { %v1099_v33 = vpop.f32.mrb[0].mxu1 }
 0x11b   :  { %v234_v34 = vadd.f32 %v1099_v33, %v981_v32  ;;  %v225_v35 = vpop.f32.mrb[1].mxu1 }
 0x11c   :  { %v226_v36 = vadd.f32 %v981_v32, %v225_v35  ;;  %v1100_v37 = vpop.f32.mrb[2].mxu1 }
 0x11d   :  { %v237_v38 = vadd.f32 %v1100_v37, %v981_v32  ;;  %v228_v39 = vpop.f32.mrb[3].mxu1  ;;  %v290_v41 = vmax.f32 %v234_v34, 0.0 }
 0x11e   :  { %v229_v40 = vadd.f32 %v981_v32, %v228_v39  ;;  %v288_v43 = vmax.f32 %v226_v36, 0.0 }
 0x11f   :  { %v291_v42 = vmax.f32 %v237_v38, 0.0 }
 0x120   :  { %v289_v44 = vmax.f32 %v229_v40, 0.0 }
 0x121   :  { %v305_v45 = vpack.c.bf16 %v291_v42, %v290_v41 }
 0x122   :  { %v304_v46 = vpack.c.bf16 %v289_v44, %v288_v43  ;;  %v1103_v47 = vpop.f32.mrb[4].mxu1 }
 0x123   :  { %v250_v48 = vadd.f32 %v1103_v47, %v981_v32  ;;  %v241_v49 = vpop.f32.mrb[5].mxu1 }
 0x124   :  { %v242_v50 = vadd.f32 %v981_v32, %v241_v49  ;;  %v1104_v51 = vpop.f32.mrb[6].mxu1  ;;  %1113 = vmatprep.subr.bf16.mxu1 %v304_v46 }
 0x125   :  { %v253_v52 = vadd.f32 %v1104_v51, %v981_v32  ;;  %v244_v53 = vpop.f32.mrb[7].mxu1  ;;  %1114 = vmatpush3.bf16.msra.mxu1 %v304_v46  ;;  %v294_v55 = vmax.f32 %v250_v48, 0.0 }
 0x126   :  { %v245_v54 = vadd.f32 %v981_v32, %v244_v53  ;;  %1115 = vmatprep.subr.bf16.mxu1 %v305_v45  ;;  %v292_v57 = vmax.f32 %v242_v50, 0.0  ;;  %v1023_v50 = vld [vmem:[%s1653_s6] ss:$0 sm:$0xff]  ;;  %s1391_s6 = smov [#allocation7]  }
 0x127   :  { %v295_v56 = vmax.f32 %v253_v52, 0.0  ;;  %s968_s11 = sshll.u32 %s1391_s6, 4  ;;  %s969_s11 = int_to_ptr.vmem [resolvable:$true] %s968_s11 }
 0x128   :  { %v293_v58 = vmax.f32 %v245_v54, 0.0  ;;  %s1359_s12 = scalar_lea.vmem %s969_s11, 2048  ;;  %p1364_p3 = scmp.lt.s32.totalorder %s969_s11, %s969_s11 }
 0x129   :  { %v307_v59 = vpack.c.bf16 %v295_v56, %v294_v55  ;;  %1116 = vmatpush3.bf16.msra.mxu1 %v305_v45  ;;  %p1360_p2 = scmp.ne.s32.totalorder %s969_s11, %s1359_s12  ;;  %p1365_p4 = scmp.lt.s32.totalorder %s1359_s12, %s1359_s12 }
 0x12a   :  { %v306_v60 = vpack.c.bf16 %v293_v58, %v292_v57  ;;  %v1107_v61 = vpop.f32.mrb[8].mxu1 }
 0x12b   :  { %v266_v62 = vadd.f32 %v1107_v61, %v981_v32  ;;  %v257_v63 = vpop.f32.mrb[9].mxu1  ;;  %p1366_p5 = por %p1365_p4, %p1364_p3 }
 0x12c   :  { %v258_v0 = vadd.f32 %v981_v32, %v257_v63  ;;  %v1108_v1 = vpop.f32.mrb[10].mxu1  ;;  %1117 = vmatprep.subr.bf16.mxu1 %v306_v60 }
 0x12d   :  { %v269_v2 = vadd.f32 %v1108_v1, %v981_v32  ;;  %v260_v3 = vpop.f32.mrb[11].mxu1  ;;  %1118 = vmatpush3.bf16.msra.mxu1 %v306_v60  ;;  %v298_v5 = vmax.f32 %v266_v62, 0.0  ;;  %p1367_p6 = pnand %p1366_p5, %p1360_p2 }
 0x12e   :  { %v261_v4 = vadd.f32 %v981_v32, %v260_v3  ;;  %1119 = vmatprep.subr.bf16.mxu1 %v307_v59  ;;  %v296_v7 = vmax.f32 %v258_v0, 0.0 }
 0x12f   :  { %v299_v6 = vmax.f32 %v269_v2, 0.0 }
 0x130   :  { %v297_v8 = vmax.f32 %v261_v4, 0.0 }
 0x131   :  { %v309_v16 = vpack.c.bf16 %v299_v6, %v298_v5  ;;  %1120 = vmatpush3.bf16.msra.mxu1 %v307_v59 }
 0x132   :  { %v308_v17 = vpack.c.bf16 %v297_v8, %v296_v7  ;;  %v1111_v18 = vpop.f32.mrb[12].mxu1 }
 0x133   :  { %v282_v19 = vadd.f32 %v1111_v18, %v981_v32  ;;  %v273_v20 = vpop.f32.mrb[13].mxu1 }
 0x134   :  { %v274_v21 = vadd.f32 %v981_v32, %v273_v20  ;;  %v1112_v22 = vpop.f32.mrb[14].mxu1  ;;  %1121 = vmatprep.subr.bf16.mxu1 %v308_v17 }
 0x135   :  { %v285_v23 = vadd.f32 %v1112_v22, %v981_v32  ;;  %v276_v24 = vpop.f32.mrb[15].mxu1  ;;  %1122 = vmatpush3.bf16.msra.mxu1 %v308_v17  ;;  %v302_v26 = vmax.f32 %v282_v19, 0.0 }
 0x136   :  { %v277_v25 = vadd.f32 %v981_v32, %v276_v24  ;;  %1123 = vmatprep.subr.bf16.mxu1 %v309_v16  ;;  %v300_v28 = vmax.f32 %v274_v21, 0.0  ;;  %v1250_v32 = vld [vmem:[#allocation5 + $0x38] sm:$0xff]  }
 0x137   :  { %v303_v27 = vmax.f32 %v285_v23, 0.0  ;;  %1177 = vmatprep.subr.bf16.mxu0 %v1250_v32 }
 0x138   :  { %v301_v29 = vmax.f32 %v277_v25, 0.0  ;;  %1178 = vmatpush3.bf16.msra.mxu0 %v1250_v32 }
 0x139   :  { %v311_v30 = vpack.c.bf16 %v303_v27, %v302_v26  ;;  %1124 = vmatpush3.bf16.msra.mxu1 %v309_v16 }
 0x13a   :  { %v310_v31 = vpack.c.bf16 %v301_v29, %v300_v28 }
 0x13c   :  { %1125 = vmatprep.subr.bf16.mxu1 %v310_v31 }
 0x13d   :  { %1126 = vmatpush3.bf16.msra.mxu1 %v310_v31 }
 0x13e   :  { %1127 = vmatprep.subr.bf16.mxu1 %v311_v30 }
 0x141   :  { %1128 = vmatpush3.bf16.msra.mxu1 %v311_v30 }
 0x144   :  { %1130 = vmatmul.mubr.bf16.vlgmr.msra.gmra.mrb[16].mxu1 %v1464_v9 }
 0x145   :  { %1133 = vmatprep.mubr.bf16.mxu1 %v1469_v10 }
 0x14c   :  { %1134 = vmatmul.mubr.bf16.gmra.mrb[20].mxu1 %v1476_v11 }
 0x14d   :  { %1137 = vmatprep.mubr.bf16.mxu1 %v1481_v12 }
 0x154   :  { %1138 = vmatmul.mubr.bf16.gmra.mrb[24].mxu1 %v1488_v13 }
 0x155   :  { %1141 = vmatprep.mubr.bf16.mxu1 %v1493_v14 }
 0x15c   :  { %1142 = vmatmul.mubr.bf16.gmra.mrb[28].mxu1 %v1500_v15 }
 0x217   :  { %v1131_v33 = vpop.f32.mrb[16].mxu1 }
 0x218   :  { %v346_v34 = vpop.f32.mrb[17].mxu1 }
 0x219   :  { %v1132_v35 = vpop.f32.mrb[18].mxu1 }
 0x21a   :  { %v410_v36 = vpack.c.bf16 %v1132_v35, %v1131_v33  ;;  %v349_v9 = vpop.f32.mrb[19].mxu1 }
 0x21b   :  { %v409_v37 = vpack.c.bf16 %v349_v9, %v346_v34 }
 0x21d   :  { %1179 = vmatprep.mubr.bf16.mxu0 %v409_v37 }
 0x21e   :  { %1180 = vmatmul.mubr.bf16.vlgmr.msra.gmra.mrb[0].mxu0 %v410_v36 }
 0x21f   :  { %v1135_v10 = vpop.f32.mrb[20].mxu1 }
 0x220   :  { %v362_v11 = vpop.f32.mrb[21].mxu1 }
 0x221   :  { %v1136_v12 = vpop.f32.mrb[22].mxu1 }
 0x222   :  { %v412_v38 = vpack.c.bf16 %v1136_v12, %v1135_v10  ;;  %v365_v13 = vpop.f32.mrb[23].mxu1 }
 0x223   :  { %v411_v39 = vpack.c.bf16 %v365_v13, %v362_v11 }
 0x225   :  { %1183 = vmatprep.mubr.bf16.mxu0 %v411_v39 }
 0x226   :  { %1184 = vmatmul.mubr.bf16.gmra.mrb[4].mxu0 %v412_v38 }
 0x227   :  { %v1139_v14 = vpop.f32.mrb[24].mxu1 }
 0x228   :  { %v378_v15 = vpop.f32.mrb[25].mxu1 }
 0x229   :  { %v1140_v40 = vpop.f32.mrb[26].mxu1 }
 0x22a   :  { %v414_v41 = vpack.c.bf16 %v1140_v40, %v1139_v14  ;;  %v381_v42 = vpop.f32.mrb[27].mxu1 }
 0x22b   :  { %v413_v43 = vpack.c.bf16 %v381_v42, %v378_v15 }
 0x22d   :  { %1187 = vmatprep.mubr.bf16.mxu0 %v413_v43 }
 0x22e   :  { %1188 = vmatmul.mubr.bf16.gmra.mrb[8].mxu0 %v414_v41 }
 0x22f   :  { %v1143_v44 = vpop.f32.mrb[28].mxu1 }
 0x230   :  { %v394_v45 = vpop.f32.mrb[29].mxu1 }
 0x231   :  { %v1144_v46 = vpop.f32.mrb[30].mxu1 }
 0x232   :  { %v416_v47 = vpack.c.bf16 %v1144_v46, %v1143_v44  ;;  %v397_v48 = vpop.f32.mrb[31].mxu1 }
 0x233   :  { %v415_v49 = vpack.c.bf16 %v397_v48, %v394_v45 }
 0x235   :  { %1191 = vmatprep.mubr.bf16.mxu0 %v415_v49 }
 0x236   :  { %1192 = vmatmul.mubr.bf16.gmra.mrb[12].mxu0 %v416_v47 }
 0x2f1   :  { %v1181_v51 = vpop.f32.mrb[0].mxu0 }
 0x2f2   :  { %v773_v52 = vadd.f32 %v1181_v51, %v1023_v50  ;;  %v701_v53 = vpop.f32.mrb[1].mxu0 }
 0x2f3   :  { %v771_v54 = vadd.f32 %v1023_v50, %v701_v53  ;;  %v1182_v55 = vpop.f32.mrb[2].mxu0 }
 0x2f4   :  { %791 = vmax.xlane.f32.xlu1 %v773_v52  ;;  %v704_v56 = vpop.f32.mrb[3].mxu0  ;;  %v774_v57 = vadd.f32 %v1182_v55, %v1023_v50 }
 0x2f5   :  { %787 = vmax.xlane.f32.xlu0 %v771_v54  ;;  %v772_v58 = vadd.f32 %v1023_v50, %v704_v56 }
 0x2f8   :  { %793 = vmax.xlane.f32.xlu1 %v774_v57 }
 0x2f9   :  { %789 = vmax.xlane.f32.xlu0 %v772_v58  ;;  %v1185_v59 = vpop.f32.mrb[4].mxu0 }
 0x2fa   :  { %v777_v60 = vadd.f32 %v1185_v59, %v1023_v50  ;;  %v717_v61 = vpop.f32.mrb[5].mxu0 }
 0x2fb   :  { %v1186_v62 = vpop.f32.mrb[6].mxu0  ;;  %v775_v1 = vadd.f32 %v1023_v50, %v717_v61 }
 0x2fc   :  { %v778_v63 = vadd.f32 %v1186_v62, %v1023_v50  ;;  %v720_v0 = vpop.f32.mrb[7].mxu0 }
 0x2fd   :  { %799 = vmax.xlane.f32.xlu0 %v777_v60  ;;  %v776_v2 = vadd.f32 %v1023_v50, %v720_v0 }
 0x2fe   :  { %801 = vmax.xlane.f32.xlu1 %v778_v63 }
 0x301   :  { %795 = vmax.xlane.f32.xlu0 %v775_v1  ;;  %v1189_v3 = vpop.f32.mrb[8].mxu0 }
 0x302   :  { %v781_v4 = vadd.f32 %v1189_v3, %v1023_v50  ;;  %797 = vmax.xlane.f32.xlu1 %v776_v2  ;;  %v733_v5 = vpop.f32.mrb[9].mxu0 }
 0x303   :  { %v1190_v6 = vpop.f32.mrb[10].mxu0  ;;  %v779_v16 = vadd.f32 %v1023_v50, %v733_v5 }
 0x304   :  { %v782_v7 = vadd.f32 %v1190_v6, %v1023_v50  ;;  %v736_v8 = vpop.f32.mrb[11].mxu0 }
 0x305   :  { %807 = vmax.xlane.f32.xlu0 %v781_v4  ;;  %v1551_v17 = vadd.f32 %v1023_v50, %v736_v8 }
 0x306   :  { %809 = vmax.xlane.f32.xlu1 %v782_v7 }
 0x309   :  { %803 = vmax.xlane.f32.xlu0 %v779_v16  ;;  %v1193_v18 = vpop.f32.mrb[12].mxu0 }
 0x30a   :  { %805 = vmax.xlane.f32.xlu1 %v1551_v17  ;;  %v749_v19 = vpop.f32.mrb[13].mxu0  ;;  %v1559_v24 = vadd.f32 %v1193_v18, %v1023_v50 }
 0x30b   :  { %v1554_v20 = vadd.f32 %v1023_v50, %v749_v19  ;;  %v1194_v21 = vpop.f32.mrb[14].mxu0 }
 0x30c   :  { %v752_v22 = vpop.f32.mrb[15].mxu0  ;;  %v1562_v25 = vadd.f32 %v1194_v21, %v1023_v50 }
 0x30d   :  { %v1556_v23 = vadd.f32 %v1023_v50, %v752_v22  ;;  %811 = vmax.xlane.f32.xlu0 %v1554_v20 }
 0x30f   :  { %813 = vmax.xlane.f32.xlu1 %v1556_v23 }
 0x311   :  { %815 = vmax.xlane.f32.xlu0 %v1559_v24 }
 0x313   :  { %817 = vmax.xlane.f32.xlu1 %v1562_v25 }
 0x381   :  { %v792_v26 = vpop.xlane.xlu1 %791 }
 0x382   :  { %v1566_v27 = vsub.f32 %v773_v52, %v792_v26  ;;  %v788_v28 = vpop.xlane.xlu0 %787 }
 0x383   :  { %v1568_v29 = vsub.f32 %v771_v54, %v788_v28 }
 0x384   :  { %v839_v30 = vmul.f32 1.442695, %v1566_v27 }
 0x385   :  { %v835_v31 = vmul.f32 1.442695, %v1568_v29  ;;  %v794_v32 = vpop.xlane.xlu1 %793 }
 0x386   :  { %1251 = vpow2.f32 %v839_v30  ;;  %v1572_v33 = vsub.f32 %v774_v57, %v794_v32  ;;  %v790_v34 = vpop.xlane.xlu0 %789 }
 0x387   :  { %v1574_v35 = vsub.f32 %v772_v58, %v790_v34  ;;  %1253 = vpow2.f32 %v835_v31 }
 0x388   :  { %v841_v36 = vmul.f32 1.442695, %v1572_v33 }
 0x389   :  { %v837_v9 = vmul.f32 1.442695, %v1574_v35 }
 0x38a   :  { %1255 = vpow2.f32 %v841_v36  ;;  %v800_v37 = vpop.xlane.xlu0 %799 }
 0x38b   :  { %v1578_v10 = vsub.f32 %v777_v60, %v800_v37  ;;  %v802_v11 = vpop.xlane.xlu1 %801  ;;  %1257 = vpow2.f32 %v837_v9 }
 0x38c   :  { %v1580_v12 = vsub.f32 %v778_v63, %v802_v11 }
 0x38d   :  { %v847_v38 = vmul.f32 1.442695, %v1578_v10 }
 0x38e   :  { %v849_v13 = vmul.f32 1.442695, %v1580_v12  ;;  %v796_v39 = vpop.xlane.xlu0 %795 }
 0x38f   :  { %1259 = vpow2.f32 %v847_v38  ;;  %v1584_v14 = vsub.f32 %v775_v1, %v796_v39  ;;  %v798_v15 = vpop.xlane.xlu1 %797 }
 0x390   :  { %v1252_v40 = vpop.eup %1251  ;;  %v1586_v41 = vsub.f32 %v776_v2, %v798_v15  ;;  %1261 = vpow2.f32 %v849_v13 }
 0x391   :  { %v843_v42 = vmul.f32 1.442695, %v1584_v14  ;;  %871 = vadd.xlane.f32.xlu0 %v1252_v40  ;;  %v1254_v45 = vpop.eup %1253 }
 0x392   :  { %v845_v43 = vmul.f32 1.442695, %v1586_v41  ;;  %v808_v44 = vpop.xlane.xlu0 %807 }
 0x393   :  { %1263 = vpow2.f32 %v843_v42  ;;  %v1590_v46 = vsub.f32 %v781_v4, %v808_v44  ;;  %v810_v47 = vpop.xlane.xlu1 %809 }
 0x394   :  { %v1256_v48 = vpop.eup %1255  ;;  %v1592_v49 = vsub.f32 %v782_v7, %v810_v47  ;;  %1265 = vpow2.f32 %v845_v43 }
 0x395   :  { %v855_v50 = vmul.f32 1.442695, %v1590_v46  ;;  %867 = vadd.xlane.f32.xlu0 %v1254_v45  ;;  %873 = vadd.xlane.f32.xlu1 %v1256_v48  ;;  %v1258_v55 = vpop.eup %1257 }
 0x396   :  { %v857_v51 = vmul.f32 1.442695, %v1592_v49  ;;  %v804_v52 = vpop.xlane.xlu0 %803 }
 0x397   :  { %1267 = vpow2.f32 %v855_v50  ;;  %v1596_v53 = vsub.f32 %v779_v16, %v804_v52  ;;  %v806_v54 = vpop.xlane.xlu1 %805 }
 0x398   :  { %v1599_v56 = vsub.f32 %v1551_v17, %v806_v54  ;;  %1269 = vpow2.f32 %v857_v51 }
 0x399   :  { %v1260_v57 = vpop.eup %1259  ;;  %v851_v58 = vmul.f32 1.442695, %v1596_v53  ;;  %869 = vadd.xlane.f32.xlu1 %v1258_v55 }
 0x39a   :  { %v853_v59 = vmul.f32 1.442695, %v1599_v56  ;;  %879 = vadd.xlane.f32.xlu0 %v1260_v57  ;;  %v812_v60 = vpop.xlane.xlu0 %811  ;;  %v1262_v62 = vpop.eup %1261 }
 0x39b   :  { %1271 = vpow2.f32 %v851_v58  ;;  %v1604_v61 = vsub.f32 %v1554_v20, %v812_v60 }
 0x39c   :  { %v814_v63 = vpop.xlane.xlu1 %813  ;;  %1273 = vpow2.f32 %v853_v59 }
 0x39d   :  { %v1264_v0 = vpop.eup %1263  ;;  %v859_v1 = vmul.f32 1.442695, %v1604_v61  ;;  %v1608_v2 = vsub.f32 %v1556_v23, %v814_v63  ;;  %881 = vadd.xlane.f32.xlu1 %v1262_v62 }
 0x39e   :  { %875 = vadd.xlane.f32.xlu0 %v1264_v0  ;;  %v816_v3 = vpop.xlane.xlu0 %815  ;;  %v1266_v6 = vpop.eup %1265 }
 0x39f   :  { %1275 = vpow2.f32 %v859_v1  ;;  %v861_v4 = vmul.f32 1.442695, %v1608_v2  ;;  %v1612_v5 = vsub.f32 %v1559_v24, %v816_v3 }
 0x3a0   :  { %v818_v7 = vpop.xlane.xlu1 %817 }
 0x3a1   :  { %v1268_v8 = vpop.eup %1267  ;;  %1277 = vpow2.f32 %v861_v4  ;;  %v863_v16 = vmul.f32 1.442695, %v1612_v5  ;;  %v1616_v17 = vsub.f32 %v1562_v25, %v818_v7  ;;  %877 = vadd.xlane.f32.xlu1 %v1266_v6 }
 0x3a2   :  { %887 = vadd.xlane.f32.xlu0 %v1268_v8  ;;  %v1270_v19 = vpop.eup %1269 }
 0x3a3   :  { %1279 = vpow2.f32 %v863_v16  ;;  %v865_v18 = vmul.f32 1.442695, %v1616_v17 }
 0x3a5   :  { %v1272_v20 = vpop.eup %1271  ;;  %1281 = vpow2.f32 %v865_v18  ;;  %889 = vadd.xlane.f32.xlu1 %v1270_v19 }
 0x3a6   :  { %883 = vadd.xlane.f32.xlu0 %v1272_v20  ;;  %v1274_v21 = vpop.eup %1273 }
 0x3a9   :  { %v1276_v22 = vpop.eup %1275  ;;  %885 = vadd.xlane.f32.xlu1 %v1274_v21 }
 0x3aa   :  { %891 = vadd.xlane.f32.xlu0 %v1276_v22 }
 0x3ab   :  { %v1278_v23 = vpop.eup %1277 }
 0x3ad   :  { %v1280_v24 = vpop.eup %1279  ;;  %893 = vadd.xlane.f32.xlu1 %v1278_v23 }
 0x3ae   :  { %895 = vadd.xlane.f32.xlu0 %v1280_v24 }
 0x3af   :  { %v1282_v25 = vpop.eup %1281 }
 0x3b1   :  { %897 = vadd.xlane.f32.xlu1 %v1282_v25 }
 0x41e   :  { %v872_v26 = vpop.xlane.xlu0 %871 }
 0x41f   :  { %1283 = vlog2.f32 %v872_v26 }
 0x422   :  { %v868_v28 = vpop.xlane.xlu0 %867  ;;  %v874_v30 = vpop.xlane.xlu1 %873 }
 0x423   :  { %1285 = vlog2.f32 %v868_v28 }
 0x424   :  { %1287 = vlog2.f32 %v874_v30 }
 0x426   :  { %v870_v31 = vpop.xlane.xlu1 %869 }
 0x427   :  { %1289 = vlog2.f32 %v870_v31  ;;  %v880_v32 = vpop.xlane.xlu0 %879 }
 0x428   :  { %1291 = vlog2.f32 %v880_v32 }
 0x429   :  { %v1284_v34 = vpop.eup %1283 }
 0x42a   :  { %v904_v36 = vmul.f32 0.6931472, %v1284_v34  ;;  %v882_v9 = vpop.xlane.xlu1 %881 }
 0x42b   :  { %1293 = vlog2.f32 %v882_v9  ;;  %v876_v37 = vpop.xlane.xlu0 %875 }
 0x42c   :  { %v933_v11 = vsub.f32 %v1566_v27, %v904_v36  ;;  %1295 = vlog2.f32 %v876_v37 }
 0x42d   :  { %v1286_v38 = vpop.eup %1285 }
 0x42e   :  { %v1288_v13 = vpop.eup %1287  ;;  %949 = vst [vmem:[#allocation7 + $0x10] sm:$0xff] %v933_v11  ;;  %v900_v39 = vmul.f32 0.6931472, %v1286_v38  ;;  %v878_v15 = vpop.xlane.xlu1 %877 }
 0x42f   :  { %v906_v40 = vmul.f32 0.6931472, %v1288_v13  ;;  %1297 = vlog2.f32 %v878_v15  ;;  %v888_v42 = vpop.xlane.xlu0 %887 }
 0x430   :  { %v931_v43 = vsub.f32 %v1568_v29, %v900_v39  ;;  %1299 = vlog2.f32 %v888_v42 }
 0x431   :  { %v1290_v44 = vpop.eup %1289  ;;  %v934_v45 = vsub.f32 %v1572_v33, %v906_v40 }
 0x432   :  { %v1292_v47 = vpop.eup %1291  ;;  %947 = vst [vmem:[#allocation7] sm:$0xff] %v931_v43  ;;  %v902_v48 = vmul.f32 0.6931472, %v1290_v44  ;;  %v890_v50 = vpop.xlane.xlu1 %889 }
 0x433   :  { %950 = vst [vmem:[#allocation7 + $0x18] sm:$0xff] %v934_v45  ;;  %v912_v27 = vmul.f32 0.6931472, %v1292_v47  ;;  %1301 = vlog2.f32 %v890_v50  ;;  %v884_v51 = vpop.xlane.xlu0 %883 }
 0x434   :  { %v932_v52 = vsub.f32 %v1574_v35, %v902_v48  ;;  %1303 = vlog2.f32 %v884_v51 }
 0x435   :  { %v1294_v54 = vpop.eup %1293  ;;  %v937_v55 = vsub.f32 %v1578_v10, %v912_v27 }
 0x436   :  { %v1296_v57 = vpop.eup %1295  ;;  %948 = vst [vmem:[#allocation7 + $0x8] sm:$0xff] %v932_v52  ;;  %v914_v29 = vmul.f32 0.6931472, %v1294_v54  ;;  %v886_v58 = vpop.xlane.xlu1 %885 }
 0x437   :  { %953 = vst [vmem:[#allocation7 + $0x30] sm:$0xff] %v937_v55  ;;  %v908_v33 = vmul.f32 0.6931472, %v1296_v57  ;;  %1305 = vlog2.f32 %v886_v58  ;;  %v892_v59 = vpop.xlane.xlu0 %891 }
 0x438   :  { %v938_v60 = vsub.f32 %v1580_v12, %v914_v29  ;;  %1307 = vlog2.f32 %v892_v59 }
 0x439   :  { %v1298_v62 = vpop.eup %1297  ;;  %v935_v63 = vsub.f32 %v1584_v14, %v908_v33 }
 0x43a   :  { %v1300_v0 = vpop.eup %1299  ;;  %954 = vst [vmem:[#allocation7 + $0x38] sm:$0xff] %v938_v60  ;;  %v910_v35 = vmul.f32 0.6931472, %v1298_v62  ;;  %v894_v1 = vpop.xlane.xlu1 %893 }
 0x43b   :  { %951 = vst [vmem:[#allocation7 + $0x20] sm:$0xff] %v935_v63  ;;  %v920_v10 = vmul.f32 0.6931472, %v1300_v0  ;;  %1309 = vlog2.f32 %v894_v1  ;;  %v896_v3 = vpop.xlane.xlu0 %895 }
 0x43c   :  { %v936_v4 = vsub.f32 %v1586_v41, %v910_v35  ;;  %1311 = vlog2.f32 %v896_v3 }
 0x43d   :  { %v1302_v6 = vpop.eup %1301  ;;  %v941_v7 = vsub.f32 %v1590_v46, %v920_v10 }
 0x43e   :  { %v1304_v8 = vpop.eup %1303  ;;  %952 = vst [vmem:[#allocation7 + $0x28] sm:$0xff] %v936_v4  ;;  %v922_v12 = vmul.f32 0.6931472, %v1302_v6  ;;  %v898_v16 = vpop.xlane.xlu1 %897 }
 0x43f   :  { %957 = vst [vmem:[#allocation7 + $0x50] sm:$0xff] %v941_v7  ;;  %v916_v14 = vmul.f32 0.6931472, %v1304_v8  ;;  %1313 = vlog2.f32 %v898_v16 }
 0x440   :  { %v942_v18 = vsub.f32 %v1592_v49, %v922_v12 }
 0x441   :  { %v1306_v19 = vpop.eup %1305  ;;  %v939_v20 = vsub.f32 %v1596_v53, %v916_v14 }
 0x442   :  { %v1308_v21 = vpop.eup %1307  ;;  %958 = vst [vmem:[#allocation7 + $0x58] sm:$0xff] %v942_v18  ;;  %v918_v22 = vmul.f32 0.6931472, %v1306_v19 }
 0x443   :  { %955 = vst [vmem:[#allocation7 + $0x40] sm:$0xff] %v939_v20  ;;  %v924_v41 = vmul.f32 0.6931472, %v1308_v21 }
 0x444   :  { %v940_v23 = vsub.f32 %v1599_v56, %v918_v22 }
 0x445   :  { %v1310_v46 = vpop.eup %1309  ;;  %v943_v24 = vsub.f32 %v1604_v61, %v924_v41 }
 0x446   :  { %v1312_v25 = vpop.eup %1311  ;;  %956 = vst [vmem:[#allocation7 + $0x48] sm:$0xff] %v940_v23  ;;  %v926_v26 = vmul.f32 0.6931472, %v1310_v46 }
 0x447   :  { %959 = vst [vmem:[#allocation7 + $0x60] sm:$0xff] %v943_v24  ;;  %v928_v28 = vmul.f32 0.6931472, %v1312_v25 }
 0x448   :  { %v944_v49 = vsub.f32 %v1608_v2, %v926_v26 }
 0x449   :  { %v1314_v30 = vpop.eup %1313  ;;  %v945_v53 = vsub.f32 %v1612_v5, %v928_v28 }
 0x44a   :  { %960 = vst [vmem:[#allocation7 + $0x68] sm:$0xff] %v944_v49  ;;  %v930_v31 = vmul.f32 0.6931472, %v1314_v30 }
 0x44b   :  { %961 = vst [vmem:[#allocation7 + $0x70] sm:$0xff] %v945_v53 }
 0x44c   :  { %v946_v56 = vsub.f32 %v1616_v17, %v930_v31 }
 0x44e   :  { %962 = vst [vmem:[#allocation7 + $0x78] sm:$0xff] %v946_v56 }
 0x44f   :  { %1370 = shalt.err (!%p1367_p6)
}
 0x450   :  { %s1371_s15 = scalar_lea.hbm %s1654_s7, 2048 }
 0x451   :  { %p1372_p7 = scmp.ne.s32.totalorder %s1654_s7, %s1371_s15  ;;  %p1375_p8 = scmp.lt.u32.totalorder %s1371_s15, %s1654_s7 }
 0x453   :  { %p1377_p9 = pnand %p1375_p8, %p1372_p7 }
 0x455   :  { %1380 = shalt.err (!%p1377_p9)
}
 0x456   :  { %s1392_s20 = smov 128   ;;  %s1393_s21 = smov 8  }
 0x457   :  { %974 = dma.vmem_to_hbm [thread:$0]  %s969_s11, 2048, %s1654_s7, [#allocation4], %s1392_s20, %s1392_s20, %s1393_s21  }
 0x458   :  { %1385 = dma.done.wait [#allocation4], 2048  }
 0x459   :  { %1386 = vsyncadd [#allocation4], 4294965248 }
 0x45a   :  { %978 = vsyncpa [#allocation3], 1 }
 0x45b   :  { %979 = vsyncpa [#allocation6], 1 }
 0x45c   :  { %980 = vsyncpa [#allocation4], 1 }

</bundles_post_ra>
